<compile_context>
chip_gen: v5e
topology: v5e:2x2
jax: 0.10.0
libtpu: 0.0.40
codegen_flags: <defaults>
</compile_context>

<pallas_src>
import functools

import jax
import jax.numpy as jnp
from jax.experimental import pallas as pl
from jax.experimental.pallas import tpu as pltpu

_LANE = 128   # feature dims padded to multiples of this (lane-dense)
_SUBLANE = 8  # node dim padded to multiples of this


def _round_up(v, m):
    return ((v + m - 1) // m) * m


def fused_gcn_kernel(a_ref, x_ref, w0_ref, b0_ref, wr_ref, br_ref,
                     o_ref, z_ref, *, num_rest):
    """Fused multi-layer GCN forward.

    Layer l:  Z <- relu(A_hat @ (Z @ W_l) + b_l).  All layers execute inside
    one kernel invocation; Z persists in a bf16 VMEM scratch and only the
    final (f32, lane-dense) activation is stored to the output.
    """
    # ---- layer 0: input_dim -> hidden_dim ----
    xw = jnp.dot(x_ref[...], w0_ref[...], preferred_element_type=jnp.float32)
    agg = jnp.dot(a_ref[...], xw.astype(jnp.bfloat16),
                  preferred_element_type=jnp.float32)
    h = jnp.maximum(agg + b0_ref[...], 0.0)          # ReLU in f32

    if num_rest == 0:
        o_ref[...] = h.astype(o_ref.dtype)
        return
    z_ref[...] = h.astype(jnp.bfloat16)

    # ---- layers 1 .. L-1: hidden_dim -> hidden_dim (statically unrolled) ----
    for li in range(num_rest):
        zw = jnp.dot(z_ref[...], wr_ref[li], preferred_element_type=jnp.float32)
        agg = jnp.dot(a_ref[...], zw.astype(jnp.bfloat16),
                      preferred_element_type=jnp.float32)
        h = jnp.maximum(agg + br_ref[li], 0.0)
        if li == num_rest - 1:
            o_ref[...] = h.astype(o_ref.dtype)       # only final Z hits HBM
        else:
            z_ref[...] = h.astype(jnp.bfloat16)


def gconv_fused(a_hat, x, w0, b0, wr, br, *, num_rest):
    """One pallas_call for the whole GConv stack (everything VMEM-resident)."""
    n_pad = a_hat.shape[0]
    f_in_p = x.shape[1]
    h_p = w0.shape[1]
    n_stack = wr.shape[0]
    kernel = functools.partial(fused_gcn_kernel, num_rest=num_rest)
    return pl.pallas_call(
        kernel,
        out_shape=jax.ShapeDtypeStruct((n_pad, h_p), jnp.float32),
        grid=(1,),
        in_specs=[
            pl.BlockSpec((n_pad, n_pad), lambda i: (0, 0)),          # A_hat (bf16)
            pl.BlockSpec((n_pad, f_in_p), lambda i: (0, 0)),         # X     (bf16)
            pl.BlockSpec((f_in_p, h_p), lambda i: (0, 0)),           # W0    (bf16)
            pl.BlockSpec((1, h_p), lambda i: (0, 0)),                # b0    (f32)
            pl.BlockSpec((n_stack, h_p, h_p), lambda i: (0, 0, 0)),  # W1..  (bf16)
            pl.BlockSpec((n_stack, 1, h_p), lambda i: (0, 0, 0)),    # b1..  (f32)
        ],
        out_specs=pl.BlockSpec((n_pad, h_p), lambda i: (0, 0)),
        scratch_shapes=[pltpu.VMEM((n_pad, h_p), jnp.bfloat16)],     # Z between layers
        compiler_params=pltpu.CompilerParams(
            dimension_semantics=("arbitrary",)),
    )(a_hat, x, w0, b0, wr, br)


def gcn_norm_dense(edge_index, edge_weight, num_nodes):
    """Dense equivalent of PyG gcn_norm (add_remaining_self_loops + sym norm).

    A_hat[t, s] = deg^{-1/2}[t] * w(s->t) * deg^{-1/2}[s].  A weight-1 self
    loop is added only to nodes that do not already have one (no double
    counting of existing self-loops).
    """
    src = edge_index[0]
    tgt = edge_index[1]
    if edge_weight is None:
        edge_weight = jnp.ones((edge_index.shape[1],), jnp.float32)
    A = jnp.zeros((num_nodes, num_nodes), jnp.float32)
    A = A.at[tgt, src].add(edge_weight)
    diag = jnp.diagonal(A)
    A = A + jnp.diag(jnp.where(diag == 0.0, 1.0, 0.0))   # remaining self loops
    deg = A.sum(axis=1)                                   # target-indexed degree
    dis = jnp.where(deg > 0, jax.lax.rsqrt(deg), 0.0)
    return dis[:, None] * A * dis[None, :]


class GConvPallas:
    """JAX/Pallas re-implementation of the PyTorch GConv module (ReLU activation)."""

    def __init__(self, input_dim, hidden_dim, num_layers, key):
        assert num_layers >= 1
        self.input_dim = input_dim
        self.hidden_dim = hidden_dim
        self.num_layers = num_layers
        self.num_rest = num_layers - 1
        self.f_in_p = _round_up(input_dim, _LANE)
        self.h_p = _round_up(hidden_dim, _LANE)

        # Glorot-uniform weights (deterministic via PRNGKey), zero bias,
        # matching GCNConv's default parameter shapes.
        dims = [input_dim] + [hidden_dim] * num_layers
        ws, bs = [], []
        for li in range(num_layers):
            key, wk = jax.random.split(key)
            f_in, f_out = dims[li], dims[li + 1]
            limit = jnp.sqrt(6.0 / (f_in + f_out))
            ws.append(jax.random.uniform(wk, (f_in, f_out), jnp.float32,
                                         -limit, limit))
            bs.append(jnp.zeros((f_out,), jnp.float32))

        # Zero-pad features to 128 lanes; weights stored bf16, biases f32.
        w0 = jnp.zeros((self.f_in_p, self.h_p), jnp.float32)
        w0 = w0.at[:input_dim, :hidden_dim].set(ws[0])
        self.w0 = w0.astype(jnp.bfloat16)
        self.b0 = jnp.zeros((1, self.h_p), jnp.float32).at[0, :hidden_dim].set(bs[0])

        n_stack = max(self.num_rest, 1)   # dummy (unused) slot if num_layers == 1
        wr = jnp.zeros((n_stack, self.h_p, self.h_p), jnp.float32)
        br = jnp.zeros((n_stack, 1, self.h_p), jnp.float32)
        for li in range(self.num_rest):
            wr = wr.at[li, :hidden_dim, :hidden_dim].set(ws[li + 1])
            br = br.at[li, 0, :hidden_dim].set(bs[li + 1])
        self.wr = wr.astype(jnp.bfloat16)
        self.br = br

    @functools.partial(jax.jit, static_argnums=0)
    def __call__(self, x, a_hat):
        n = a_hat.shape[0]
        n_pad = _round_up(n, _SUBLANE)
        a_p = jnp.zeros((n_pad, n_pad), jnp.bfloat16)
        a_p = a_p.at[:n, :n].set(a_hat.astype(jnp.bfloat16))
        x_p = jnp.zeros((n_pad, self.f_in_p), jnp.bfloat16)
        x_p = x_p.at[:n, :x.shape[1]].set(x.astype(jnp.bfloat16))
        out_p = gconv_fused(a_p, x_p, self.w0, self.b0, self.wr, self.br,
                            num_rest=self.num_rest)
        return out_p[:n, :self.hidden_dim]


if __name__ == "__main__":
    key = jax.random.PRNGKey(0)
    k_x, k_ew, k_model = jax.random.split(key, 3)

    num_nodes = 16
    input_dim = 8
    hidden_dim = 32
    num_layers = 2

    # Node features [N, F_in].
    x = jax.random.normal(k_x, (num_nodes, input_dim), jnp.float32)

    # Deterministic small graph: ring edges in both directions + a few chords.
    src = list(range(num_nodes)) + list(range(num_nodes)) + [0, 3, 5, 7]
    tgt = ([(i + 1) % num_nodes for i in range(num_nodes)]
           + [(i - 1) % num_nodes for i in range(num_nodes)]
           + [8, 11, 13, 2])
    edge_index = jnp.array([src, tgt], dtype=jnp.int32)       # [2, E]
    edge_weight = jax.random.uniform(
        k_ew, (edge_index.shape[1],), jnp.float32, 0.5, 1.5)

    # Glue: densify + normalize the adjacency (cheap, done once in plain JAX).
    a_hat = gcn_norm_dense(edge_index, edge_weight, num_nodes)

    model = GConvPallas(input_dim, hidden_dim, num_layers, k_model)
    out = model(x, a_hat)
    jax.block_until_ready(out)

    assert out.shape == (num_nodes, hidden_dim)
    assert bool(jnp.all(out >= 0.0))          # ReLU applied after every layer
    print("KERNEL_OK")
</pallas_src>

<mosaic_0001>
module attributes {stable_mosaic.version = 11 : i64} {
  func.func @fused_gcn_kernel(%arg0: i32, %arg1: memref<16x16xbf16, #tpu.memory_space<vmem>>, %arg2: memref<16x128xbf16, #tpu.memory_space<vmem>>, %arg3: memref<128x128xbf16, #tpu.memory_space<vmem>>, %arg4: memref<1x128xf32, #tpu.memory_space<vmem>>, %arg5: memref<1x128x128xbf16, #tpu.memory_space<vmem>>, %arg6: memref<1x1x128xf32, #tpu.memory_space<vmem>>, %arg7: memref<16x128xf32, #tpu.memory_space<vmem>>, %arg8: memref<16x128xbf16, #tpu.memory_space<vmem>>) attributes {dimension_semantics = [#tpu.dimension_semantics<arbitrary>], iteration_bounds = array<i64: 1>, scalar_prefetch = 0 : i64, scratch_operands = 1 : i64, tpu.core_type = #tpu.core_type<tc>, window_params = [{pipeline_mode = #tpu.pipeline_mode<synchronous>, transform_indices = @transform_0, window_bounds = array<i64: 16, 16>}, {pipeline_mode = #tpu.pipeline_mode<synchronous>, transform_indices = @transform_1, window_bounds = array<i64: 16, 128>}, {pipeline_mode = #tpu.pipeline_mode<synchronous>, transform_indices = @transform_2, window_bounds = array<i64: 128, 128>}, {pipeline_mode = #tpu.pipeline_mode<synchronous>, transform_indices = @transform_3, window_bounds = array<i64: 1, 128>}, {pipeline_mode = #tpu.pipeline_mode<synchronous>, transform_indices = @transform_4, window_bounds = array<i64: 1, 128, 128>}, {pipeline_mode = #tpu.pipeline_mode<synchronous>, transform_indices = @transform_5, window_bounds = array<i64: 1, 1, 128>}, {pipeline_mode = #tpu.pipeline_mode<synchronous>, transform_indices = @transform_6, window_bounds = array<i64: 16, 128>}]} {
    %c0 = arith.constant 0 : index
    %c0_0 = arith.constant 0 : index
    %0 = vector.load %arg2[%c0, %c0_0] : memref<16x128xbf16, #tpu.memory_space<vmem>>, vector<16x128xbf16>
    %c0_1 = arith.constant 0 : index
    %c0_2 = arith.constant 0 : index
    %1 = vector.load %arg3[%c0_1, %c0_2] : memref<128x128xbf16, #tpu.memory_space<vmem>>, vector<128x128xbf16>
    %cst = arith.constant dense<0.000000e+00> : vector<16x128xf32>
    %2 = tpu.matmul %0, %1, %cst {dimension_numbers = #tpu.dot_dimension_numbers<[1], [0], [0], [1], [0, 0, 1, 1], [], []>} : vector<16x128xbf16>, vector<128x128xbf16>, vector<16x128xf32> -> vector<16x128xf32>
    %c0_3 = arith.constant 0 : index
    %c0_4 = arith.constant 0 : index
    %3 = vector.load %arg1[%c0_3, %c0_4] : memref<16x16xbf16, #tpu.memory_space<vmem>>, vector<16x16xbf16>
    %4 = arith.truncf %2 : vector<16x128xf32> to vector<16x128xbf16>
    %cst_5 = arith.constant dense<0.000000e+00> : vector<16x128xf32>
    %5 = tpu.matmul %3, %4, %cst_5 {dimension_numbers = #tpu.dot_dimension_numbers<[1], [0], [0], [1], [0, 0, 1, 1], [], []>} : vector<16x16xbf16>, vector<16x128xbf16>, vector<16x128xf32> -> vector<16x128xf32>
    %c0_6 = arith.constant 0 : index
    %c0_7 = arith.constant 0 : index
    %6 = vector.load %arg4[%c0_6, %c0_7] : memref<1x128xf32, #tpu.memory_space<vmem>>, vector<1x128xf32>
    %7 = vector.broadcast %6 : vector<1x128xf32> to vector<16x128xf32>
    %8 = arith.addf %5, %7 : vector<16x128xf32>
    %cst_8 = arith.constant 0.000000e+00 : f32
    %9 = vector.broadcast %cst_8 : f32 to vector<16x128xf32>
    %10 = arith.maximumf %8, %9 : vector<16x128xf32>
    %11 = arith.truncf %10 : vector<16x128xf32> to vector<16x128xbf16>
    %c0_9 = arith.constant 0 : index
    %c0_10 = arith.constant 0 : index
    %12 = vector.load %arg8[%c0_9, %c0_10] : memref<16x128xbf16, #tpu.memory_space<vmem>>, vector<16x128xbf16>
    tpu.vector_store %arg8[%c0_9, %c0_10], %11 {strides = array<i32>} : memref<16x128xbf16, #tpu.memory_space<vmem>>, vector<16x128xbf16>,
    %c0_11 = arith.constant 0 : index
    %c0_12 = arith.constant 0 : index
    %13 = vector.load %arg8[%c0_11, %c0_12] : memref<16x128xbf16, #tpu.memory_space<vmem>>, vector<16x128xbf16>
    %c0_13 = arith.constant 0 : index
    %c0_14 = arith.constant 0 : index
    %c0_15 = arith.constant 0 : index
    %14 = vector.load %arg5[%c0_13, %c0_14, %c0_15] : memref<1x128x128xbf16, #tpu.memory_space<vmem>>, vector<1x128x128xbf16>
    %15 = vector.shape_cast %14 : vector<1x128x128xbf16> to vector<128x128xbf16>
    %cst_16 = arith.constant dense<0.000000e+00> : vector<16x128xf32>
    %16 = tpu.matmul %13, %15, %cst_16 {dimension_numbers = #tpu.dot_dimension_numbers<[1], [0], [0], [1], [0, 0, 1, 1], [], []>} : vector<16x128xbf16>, vector<128x128xbf16>, vector<16x128xf32> -> vector<16x128xf32>
    %c0_17 = arith.constant 0 : index
    %c0_18 = arith.constant 0 : index
    %17 = vector.load %arg1[%c0_17, %c0_18] : memref<16x16xbf16, #tpu.memory_space<vmem>>, vector<16x16xbf16>
    %18 = arith.truncf %16 : vector<16x128xf32> to vector<16x128xbf16>
    %cst_19 = arith.constant dense<0.000000e+00> : vector<16x128xf32>
    %19 = tpu.matmul %17, %18, %cst_19 {dimension_numbers = #tpu.dot_dimension_numbers<[1], [0], [0], [1], [0, 0, 1, 1], [], []>} : vector<16x16xbf16>, vector<16x128xbf16>, vector<16x128xf32> -> vector<16x128xf32>
    %c0_20 = arith.constant 0 : index
    %c0_21 = arith.constant 0 : index
    %c0_22 = arith.constant 0 : index
    %20 = vector.load %arg6[%c0_20, %c0_21, %c0_22] : memref<1x1x128xf32, #tpu.memory_space<vmem>>, vector<1x1x128xf32>
    %21 = vector.shape_cast %20 : vector<1x1x128xf32> to vector<1x128xf32>
    %22 = vector.broadcast %21 : vector<1x128xf32> to vector<16x128xf32>
    %23 = arith.addf %19, %22 : vector<16x128xf32>
    %cst_23 = arith.constant 0.000000e+00 : f32
    %24 = vector.broadcast %cst_23 : f32 to vector<16x128xf32>
    %25 = arith.maximumf %23, %24 : vector<16x128xf32>
    %c0_24 = arith.constant 0 : index
    %c0_25 = arith.constant 0 : index
    %26 = vector.load %arg7[%c0_24, %c0_25] : memref<16x128xf32, #tpu.memory_space<vmem>>, vector<16x128xf32>
    tpu.vector_store %arg7[%c0_24, %c0_25], %25 {strides = array<i32>} : memref<16x128xf32, #tpu.memory_space<vmem>>, vector<16x128xf32>,
    return
  }
  func.func @transform_0(%arg0: i32) -> (i32, i32) {
    %c0_i32 = arith.constant 0 : i32
    %c0_i32_0 = arith.constant 0 : i32
    %c0_i32_1 = arith.constant 0 : i32
    return %c0_i32, %c0_i32_0 : i32, i32
  }
  func.func @transform_1(%arg0: i32) -> (i32, i32) {
    %c0_i32 = arith.constant 0 : i32
    %c0_i32_0 = arith.constant 0 : i32
    %c0_i32_1 = arith.constant 0 : i32
    return %c0_i32, %c0_i32_0 : i32, i32
  }
  func.func @transform_2(%arg0: i32) -> (i32, i32) {
    %c0_i32 = arith.constant 0 : i32
    %c0_i32_0 = arith.constant 0 : i32
    %c0_i32_1 = arith.constant 0 : i32
    return %c0_i32, %c0_i32_0 : i32, i32
  }
  func.func @transform_3(%arg0: i32) -> (i32, i32) {
    %c0_i32 = arith.constant 0 : i32
    %c0_i32_0 = arith.constant 0 : i32
    %c0_i32_1 = arith.constant 0 : i32
    return %c0_i32, %c0_i32_0 : i32, i32
  }
  func.func @transform_4(%arg0: i32) -> (i32, i32, i32) {
    %c0_i32 = arith.constant 0 : i32
    %c0_i32_0 = arith.constant 0 : i32
    %c0_i32_1 = arith.constant 0 : i32
    %c0_i32_2 = arith.constant 0 : i32
    return %c0_i32, %c0_i32_0, %c0_i32_1 : i32, i32, i32
  }
  func.func @transform_5(%arg0: i32) -> (i32, i32, i32) {
    %c0_i32 = arith.constant 0 : i32
    %c0_i32_0 = arith.constant 0 : i32
    %c0_i32_1 = arith.constant 0 : i32
    %c0_i32_2 = arith.constant 0 : i32
    return %c0_i32, %c0_i32_0, %c0_i32_1 : i32, i32, i32
  }
  func.func @transform_6(%arg0: i32) -> (i32, i32) {
    %c0_i32 = arith.constant 0 : i32
    %c0_i32_0 = arith.constant 0 : i32
    %c0_i32_1 = arith.constant 0 : i32
    return %c0_i32, %c0_i32_0 : i32, i32
  }
}

</mosaic_0001>

<bundles_post_ra>
// kernel: a_call__.1
= control target key start
LH: loop header
LB: loop body
LE: loop exit
PB: predicated region body
PF: predicated region fallthrough
CT: control target
= control target key end

     0   :  { %11 = vsyncpa [#allocation4], 0  ;;  %s580_s0 = inlined_call_operand.vmem [shape: bf16[16,16], index: 0, kind: input, shape index: {}]   ;;  %s581_s1 = inlined_call_operand.vmem [shape: bf16[16,128], index: 1, kind: input, shape index: {}]   ;;  %s582_s2 = inlined_call_operand.hbm [shape: bf16[128,128], index: 2, kind: input, shape index: {}]   ;;  %s583_s3 = inlined_call_operand.vmem [shape: f32[1,128], index: 3, kind: input, shape index: {}]   ;;  %s584_s4 = inlined_call_operand.hbm [shape: bf16[1,128,128], index: 4, kind: input, shape index: {}]   ;;  %s585_s5 = inlined_call_operand.vmem [shape: f32[1,1,128], index: 5, kind: input, shape index: {}]   ;;  %s586_s6 = inlined_call_operand.hbm [shape: f32[16,128], index: 6, kind: output, shape index: {}]  }
   0x1   :  { %12 = vsyncpa [#allocation7], 0 }
   0x2   :  { %13 = vsyncpa [#allocation5], 0  ;;  %s22_s23 = sshll.u32 %s582_s2, 4  ;;  %s512_s24 = smov [#allocation3]   ;;  %s23_s23 = int_to_ptr.hbm [resolvable:$true] %s22_s23 }
   0x3   :  { %s24_s25 = sshll.u32 %s512_s24, 4  ;;  %s37_s28 = sshll.u32 %s584_s4, 4  ;;  %s25_s25 = int_to_ptr.vmem [resolvable:$true] %s24_s25  ;;  %s38_s28 = int_to_ptr.hbm [resolvable:$true] %s37_s28 }
   0x4   :  { %s513_s29 = smov 64   ;;  %s514_s30 = smov 4  }
   0x5   :  { %30 = dma.hbm_to_vmem [thread:$0]  %s23_s23, 1024, %s25_s25, [#allocation4], %s513_s29, %s513_s29, %s514_s30  }
   0x6   :  { %s515_s7 = smov [#allocation6]  }
   0x7   :  { %s39_s8 = sshll.u32 %s515_s7, 4  ;;  %s40_s8 = int_to_ptr.vmem [resolvable:$true] %s39_s8 }
   0x8   :  { %45 = dma.hbm_to_vmem [thread:$0]  %s38_s28, 1024, %s40_s8, [#allocation7], %s513_s29, %s513_s29, %s514_s30  }
   0x9   :  { %506 = dma.done.wait [#allocation4], 1024  }
   0xa   :  { %507 = vsyncadd [#allocation4], 4294966272 }
   0xb   :  { %508 = dma.done.wait [#allocation7], 1024  }
   0xc   :  { %509 = vsyncadd [#allocation7], 4294966272  ;;  %v408_v0 = vld [vmem:[#allocation3 + $0x38] sm:$0xff]  ;;  %v407_v1 = vld [vmem:[#allocation3 + $0x30] sm:$0xff]  ;;  %vm155_vm0 = vcmask 130048   ;;  %s516_s15 = smov [#allocation8]  }
   0xd   :  { %129 = vmatpush.bf16.msra.mxu0 %v408_v0  ;;  %v406_v2 = vld [vmem:[#allocation3 + $0x28] sm:$0xff]  ;;  %v405_v3 = vld [vmem:[#allocation3 + $0x20] sm:$0xff]  ;;  %v404_v4 = vld [vmem:[#allocation3 + $0x18] sm:$0xff]  ;;  %s302_s16 = sshll.u32 %s516_s15, 4  ;;  %s304_s19 = sshll.u32 %s586_s6, 4  ;;  %s303_s16 = int_to_ptr.vmem [resolvable:$true] %s302_s16  ;;  %s305_s19 = int_to_ptr.hbm [resolvable:$true] %s304_s19 }
   0xe   :  { %v403_v5 = vld [vmem:[#allocation3 + $0x10] sm:$0xff]  ;;  %v402_v6 = vld [vmem:[#allocation3 + $0x8] sm:$0xff]  ;;  %v401_v7 = vld [vmem:[#allocation3] sm:$0xff]  ;;  %s518_s20 = smov 8  }
   0xf   :  { %v400_v8 = vld [vmem:[%s581_s1] sm:$0xff]  ;;  %v417_v10 = vld [vmem:[#allocation6 + $0x30] sm:$0xff]  ;;  %v416_v15 = vld [vmem:[#allocation6 + $0x28] sm:$0xff] }
  0x10   :  { %v418_v9 = vld [vmem:[#allocation6 + $0x38] sm:$0xff]  ;;  %v415_v16 = vld [vmem:[#allocation6 + $0x20] sm:$0xff]  ;;  %v413_v18 = vld [vmem:[#allocation6 + $0x10] sm:$0xff] }
  0x11   :  { %130 = vmatpush.bf16.msra.mxu0 %v407_v1  ;;  %251 = vmatpush.bf16.msra.mxu2 %v418_v9  ;;  %v409_v14 = vld [vmem:[%s580_s0] sm:$0xff]  ;;  %v412_v19 = vld [vmem:[#allocation6 + $0x8] sm:$0xff]  ;;  %v411_v20 = vld [vmem:[#allocation6] sm:$0xff] }
  0x12   :  { %v414_v17 = vld [vmem:[#allocation6 + $0x18] sm:$0xff] }
  0x13   :  { %v432_v22 = vld [vmem:[%s583_s3] ss:$0 sm:$0xff] }
  0x14   :  { %v419_v33 = vld [vmem:[%s580_s0] sm:$0xff]  ;;  %s517_s0 = smov 128  }
  0x15   :  { %131 = vmatpush.bf16.msra.mxu0 %v406_v2  ;;  %252 = vmatpush.bf16.msra.mxu2 %v417_v10  ;;  %v433_v34 = vld [vmem:[%s585_s5] ss:$0 sm:$0xff] }
  0x19   :  { %132 = vmatpush.bf16.msra.mxu0 %v405_v3  ;;  %253 = vmatpush.bf16.msra.mxu2 %v416_v15 }
  0x1d   :  { %133 = vmatpush.bf16.msra.mxu0 %v404_v4  ;;  %254 = vmatpush.bf16.msra.mxu2 %v415_v16 }
  0x21   :  { %134 = vmatpush.bf16.msra.mxu0 %v403_v5  ;;  %255 = vmatpush.bf16.msra.mxu2 %v414_v17 }
  0x25   :  { %135 = vmatpush.bf16.msra.mxu0 %v402_v6  ;;  %256 = vmatpush.bf16.msra.mxu2 %v413_v18 }
  0x29   :  { %136 = vmatpush.bf16.msra.mxu0 %v401_v7  ;;  %257 = vmatpush.bf16.msra.mxu2 %v412_v19 }
  0x2c   :  { %137 = vmatmul.bf16.vlgmr.msra.gmra.mxu0 %v400_v8 }
  0x2d   :  { %258 = vmatpush.bf16.msra.mxu2 %v411_v20 }
  0xa9   :  { %v138_v11 = vpop.f32.mrf.mxu0 }
  0xb1   :  { %v140_v12 = vpop.f32.mrf.mxu0 }
  0xb2   :  { %v145_v13 = vpack.c.bf16 %v140_v12, %v138_v11 }
  0xb4   :  { %166 = vmatpush.bf16.msra.mxu1 %v145_v13 }
  0xb7   :  { %358 = vmatmul.msk.bf16.vlgmr.msra.gmra.mxu1 %vm155_vm0, %v409_v14 }
 0x134   :  { %v168_v21 = vpop.f32.mrf.mxu1 }
 0x135   :  { %v169_v23 = vadd.f32 %v432_v22, %v168_v21 }
 0x137   :  { %v173_v26 = vmax.f32 %v169_v23, 0.0 }
 0x13c   :  { %v170_v24 = vpop.f32.mrf.mxu1 }
 0x13d   :  { %v171_v25 = vadd.f32 %v432_v22, %v170_v24 }
 0x13f   :  { %v174_v27 = vmax.f32 %v171_v25, 0.0 }
 0x141   :  { %v423_v28 = vpack.c.bf16 %v174_v27, %v173_v26 }
 0x143   :  { %424 = vst [vmem:[#allocation2] sm:$0xff] %v423_v28  }
 0x14a   :  { %v410_v29 = vld [vmem:[#allocation2] sm:$0xff] }
 0x14b   :  { %259 = vmatmul.bf16.vlgmr.msra.gmra.mxu2 %v410_v29 }
 0x1ce   :  { %v260_v30 = vpop.f32.mrf.mxu2 }
 0x1d6   :  { %v262_v31 = vpop.f32.mrf.mxu2 }
 0x1d7   :  { %v267_v32 = vpack.c.bf16 %v262_v31, %v260_v30 }
 0x1d9   :  { %287 = vmatpush.bf16.msra.mxu3 %v267_v32 }
 0x1dc   :  { %399 = vmatmul.msk.bf16.vlgmr.msra.gmra.mxu3 %vm155_vm0, %v419_v33 }
 0x25f   :  { %v289_v35 = vpop.f32.mrf.mxu3 }
 0x260   :  { %v290_v36 = vadd.f32 %v433_v34, %v289_v35 }
 0x262   :  { %v294_v37 = vmax.f32 %v290_v36, 0.0 }
 0x264   :  { %296 = vst [vmem:[#allocation8] sm:$0xff] %v294_v37 }
 0x267   :  { %v291_v38 = vpop.f32.mrf.mxu3 }
 0x268   :  { %v292_v39 = vadd.f32 %v433_v34, %v291_v38 }
 0x26a   :  { %v295_v40 = vmax.f32 %v292_v39, 0.0 }
 0x26c   :  { %297 = vst [vmem:[#allocation8 + $0x8] sm:$0xff] %v295_v40 }
 0x26d   :  { %310 = dma.vmem_to_hbm [thread:$0]  %s303_s16, 256, %s305_s19, [#allocation5], %s517_s0, %s517_s0, %s518_s20  }
 0x26e   :  { %510 = dma.done.wait [#allocation5], 256  }
 0x26f   :  { %511 = vsyncadd [#allocation5], 4294967040 }
 0x270   :  { %315 = vsyncpa [#allocation4], 1 }
 0x271   :  { %316 = vsyncpa [#allocation7], 1 }
 0x272   :  { %317 = vsyncpa [#allocation5], 1 }

</bundles_post_ra>
